<compile_context>
chip_gen: v5e
topology: v5e:2x2
jax: 0.10.0
libtpu: 0.0.40
codegen_flags: <defaults>
</compile_context>

<pallas_src>
import functools

import jax
import jax.numpy as jnp
from jax.experimental import pallas as pl
from jax.experimental.pallas import tpu as pltpu

# Layer sizes (fixed by the PyTorch module).
D_IN, D_H1, D_H2, D_H3, D_OUT = 12, 32, 32, 16, 2

# Row offsets of each (transposed) layer inside the packed buffers.
# All offsets are multiples of 16 (bf16 sublane tile).
R1, R2, R3, R4 = 0, D_H1, D_H1 + D_H2, D_H1 + D_H2 + D_H3        # 0, 32, 64, 80
R_TOTAL = 88                                                      # 82 padded
W_COLS = 32                                                       # max fan-in

FLOPS_PER_ELEM = 2 * (D_IN * D_H1 + D_H1 * D_H2 + D_H2 * D_H3 + D_H3 * D_OUT)


def _round_up(n, m):
    return ((n + m - 1) // m) * m


def neuro_fuzzy_kernel(x_ref, w_ref, b_ref, out_ref):
    # x_ref  : (TB, 12) f32   batch-major input block, straight from HBM
    # w_ref  : (88, 32) bf16  packed transposed weights (grid-invariant)
    # b_ref  : (88, 1)  f32   packed biases             (grid-invariant)
    # out_ref: (2,  TB) f32   row 0 = left, row 1 = right (batch on lanes)
    x = x_ref[...].astype(jnp.bfloat16)               # (TB, 12)

    w1t = w_ref[R1:R1 + D_H1, 0:D_IN]                 # (32, 12)
    w2t = w_ref[R2:R2 + D_H2, 0:D_H1]                 # (32, 32)
    w3t = w_ref[R3:R3 + D_H3, 0:D_H2]                 # (16, 32)
    wht = w_ref[R4:R4 + D_OUT, 0:D_H3]                # (2, 16)

    b1 = b_ref[R1:R1 + D_H1, :]
    b2 = b_ref[R2:R2 + D_H2, :]
    b3 = b_ref[R3:R3 + D_H3, :]
    bh = b_ref[R4:R4 + D_OUT, :]

    # Layer 1 contracts the feature axis of both operands (A @ B^T form),
    # putting the batch onto the lane axis with no wrapper-side transpose.
    h = jnp.einsum('of,bf->ob', w1t, x,
                   preferred_element_type=jnp.float32) + b1     # (32, TB) f32
    h = jnp.maximum(h, 0.0)
    # Remaining layers stay in lane-dense transposed orientation.
    h = jnp.dot(w2t, h.astype(jnp.bfloat16),
                preferred_element_type=jnp.float32) + b2        # (32, TB)
    h = jnp.maximum(h, 0.0)
    h = jnp.dot(w3t, h.astype(jnp.bfloat16),
                preferred_element_type=jnp.float32) + b3        # (16, TB)
    h = jnp.maximum(h, 0.0)
    out = jnp.dot(wht, h.astype(jnp.bfloat16),
                  preferred_element_type=jnp.float32) + bh      # (2, TB)

    out_ref[...] = out.astype(out_ref.dtype)


def pack_params(params):
    """Pack transposed bf16 weights and f32 biases into two flat buffers."""
    wbuf = jnp.zeros((R_TOTAL, W_COLS), jnp.bfloat16)
    bbuf = jnp.zeros((R_TOTAL, 1), jnp.float32)

    def put(wbuf, bbuf, row, w, b):
        wt = jnp.asarray(w).T.astype(jnp.bfloat16)        # (out, in)
        bt = jnp.asarray(b).T.astype(jnp.float32)         # (out, 1)
        wbuf = wbuf.at[row:row + wt.shape[0], 0:wt.shape[1]].set(wt)
        bbuf = bbuf.at[row:row + wt.shape[0], :].set(bt)
        return wbuf, bbuf

    # Fuse the two 16->1 heads into one 16->2 layer.
    wh = jnp.concatenate([params["wl"], params["wr"]], axis=1)   # (16, 2)
    bh = jnp.concatenate([params["bl"], params["br"]], axis=1)   # (1, 2)

    wbuf, bbuf = put(wbuf, bbuf, R1, params["w1"], params["b1"])
    wbuf, bbuf = put(wbuf, bbuf, R2, params["w2"], params["b2"])
    wbuf, bbuf = put(wbuf, bbuf, R3, params["w3"], params["b3"])
    wbuf, bbuf = put(wbuf, bbuf, R4, wh, bh)
    return wbuf, bbuf


@functools.partial(jax.jit, static_argnames=("block_batch",))
def neuro_fuzzy_forward(x, wbuf, bbuf, *, block_batch=8192):
    """x: (B, 12) float32.  Returns a (2, B) f32 slab: row 0 = left, row 1 = right.

    Zero wrapper-side copies when B is a multiple of the batch tile; otherwise
    a single zero-pad of x and a column-slice of the output.
    """
    B = x.shape[0]
    if x.dtype != jnp.float32:
        x = x.astype(jnp.float32)

    # Batch tile: multiple of 128 (lane width); at least 2 grid steps when
    # possible so v7x megacore splits the batch; capped so the lane-padded
    # (TB, 12) f32 input double-buffer stays well inside VMEM on all chips.
    TB = min(block_batch, _round_up(max(-(-B // 2), 1), 128))
    Bp = _round_up(B, TB)
    if Bp != B:
        x = jnp.pad(x, ((0, Bp - B), (0, 0)))

    out = pl.pallas_call(
        neuro_fuzzy_kernel,
        out_shape=jax.ShapeDtypeStruct((D_OUT, Bp), jnp.float32),
        grid=(Bp // TB,),
        in_specs=[
            pl.BlockSpec((TB, D_IN), lambda i: (i, 0)),          # x tile (batch-major)
            pl.BlockSpec((R_TOTAL, W_COLS), lambda i: (0, 0)),   # weights (resident)
            pl.BlockSpec((R_TOTAL, 1), lambda i: (0, 0)),        # biases  (resident)
        ],
        out_specs=pl.BlockSpec((D_OUT, TB), lambda i: (0, i)),   # lane-dense output
        compiler_params=pltpu.CompilerParams(
            dimension_semantics=("parallel",),
            vmem_limit_bytes=32 * 1024 * 1024),
        cost_estimate=pl.CostEstimate(
            flops=FLOPS_PER_ELEM * Bp,
            transcendentals=0,
            bytes_accessed=(D_IN * 4 + D_OUT * 4) * Bp
                           + (R_TOTAL * W_COLS * 2 + R_TOTAL * 4)),
    )(x, wbuf, bbuf)

    if Bp != B:
        out = out[:, :B]
    return out


def neuro_fuzzy_forward_torch_like(x, wbuf, bbuf, **kw):
    """PyTorch-parity convenience: returns (left, right), each (B, 1) f32."""
    out = neuro_fuzzy_forward(x, wbuf, bbuf, **kw)
    return out[0].reshape(-1, 1), out[1].reshape(-1, 1)


def init_params(key):
    """PyTorch nn.Linear default init: U(-1/sqrt(fan_in), 1/sqrt(fan_in))."""
    def linear(key, fan_in, fan_out):
        kw, kb = jax.random.split(key)
        bound = 1.0 / (fan_in ** 0.5)
        w = jax.random.uniform(kw, (fan_in, fan_out), jnp.float32, -bound, bound)
        b = jax.random.uniform(kb, (1, fan_out), jnp.float32, -bound, bound)
        return w, b

    keys = jax.random.split(key, 5)
    w1, b1 = linear(keys[0], 12, 32)
    w2, b2 = linear(keys[1], 32, 32)
    w3, b3 = linear(keys[2], 32, 16)
    wl, bl = linear(keys[3], 16, 1)
    wr, br = linear(keys[4], 16, 1)
    return dict(w1=w1, b1=b1, w2=w2, b2=b2, w3=w3, b3=b3,
                wl=wl, bl=bl, wr=wr, br=br)


def reference_forward(x, p):
    """Pure-f32 reference matching the PyTorch NeuroFuzzyModel forward."""
    hp = jax.lax.Precision.HIGHEST

    def lin(h, w, b):
        return jnp.dot(h, w, precision=hp) + b

    h = jnp.maximum(lin(x, p["w1"], p["b1"]), 0.0)
    h = jnp.maximum(lin(h, p["w2"], p["b2"]), 0.0)
    h = jnp.maximum(lin(h, p["w3"], p["b3"]), 0.0)
    return lin(h, p["wl"], p["bl"]), lin(h, p["wr"], p["br"])


if __name__ == "__main__":
    key = jax.random.PRNGKey(0)
    k_params, k1, k2, k3 = jax.random.split(key, 4)

    params = init_params(k_params)
    wbuf, bbuf = pack_params(params)

    # Kernel uses bf16 operands with f32 accumulation; compare against the
    # pure-f32 PyTorch-equivalent reference with bf16-level tolerance.
    TOL = dict(atol=2e-2, rtol=2e-2)

    # 1) Tiny batch: single padded tile, PyTorch-style (left, right) outputs.
    B = 8
    x = jax.random.normal(k1, (B, 12), jnp.float32)
    left, right = neuro_fuzzy_forward_torch_like(x, wbuf, bbuf)
    jax.block_until_ready((left, right))
    ref_l, ref_r = reference_forward(x, params)
    assert left.shape == (B, 1) and right.shape == (B, 1)
    assert jnp.allclose(left, ref_l, **TOL)
    assert jnp.allclose(right, ref_r, **TOL)

    # 2) Non-multiple batch: multi-step grid + padding / output-slice path.
    B2 = 1000
    x2 = jax.random.normal(k2, (B2, 12), jnp.float32)
    out2 = neuro_fuzzy_forward(x2, wbuf, bbuf)
    jax.block_until_ready(out2)
    ref_l2, ref_r2 = reference_forward(x2, params)
    assert out2.shape == (2, B2)
    assert jnp.allclose(out2[0], ref_l2[:, 0], **TOL)
    assert jnp.allclose(out2[1], ref_r2[:, 0], **TOL)

    # 3) Tile-aligned batch: zero-copy path (no pad, no slice), 2 grid steps.
    B3 = 1024
    x3 = jax.random.normal(k3, (B3, 12), jnp.float32)
    out3 = neuro_fuzzy_forward(x3, wbuf, bbuf)
    jax.block_until_ready(out3)
    ref_l3, ref_r3 = reference_forward(x3, params)
    assert out3.shape == (2, B3)
    assert jnp.allclose(out3[0], ref_l3[:, 0], **TOL)
    assert jnp.allclose(out3[1], ref_r3[:, 0], **TOL)

    print("KERNEL_OK")
</pallas_src>

<mosaic_0001>
module attributes {stable_mosaic.version = 11 : i64} {
  func.func @neuro_fuzzy_kernel(%arg0: i32, %arg1: memref<128x12xf32, #tpu.memory_space<vmem>>, %arg2: memref<88x32xbf16, #tpu.memory_space<vmem>>, %arg3: memref<88x1xf32, #tpu.memory_space<vmem>>, %arg4: memref<2x128xf32, #tpu.memory_space<vmem>>) attributes {dimension_semantics = [#tpu.dimension_semantics<parallel>], iteration_bounds = array<i64: 1>, scalar_prefetch = 0 : i64, scratch_operands = 0 : i64, tpu.core_type = #tpu.core_type<tc>, window_params = [{transform_indices = @transform_0, window_bounds = array<i64: 128, 12>}, {pipeline_mode = #tpu.pipeline_mode<synchronous>, transform_indices = @transform_1, window_bounds = array<i64: 88, 32>}, {pipeline_mode = #tpu.pipeline_mode<synchronous>, transform_indices = @transform_2, window_bounds = array<i64: 88, 1>}, {transform_indices = @transform_3, window_bounds = array<i64: 2, 128>}]} {
    %c0 = arith.constant 0 : index
    %c0_0 = arith.constant 0 : index
    %0 = vector.load %arg1[%c0, %c0_0] : memref<128x12xf32, #tpu.memory_space<vmem>>, vector<128x12xf32>
    %1 = arith.truncf %0 : vector<128x12xf32> to vector<128x12xbf16>
    %c0_1 = arith.constant 0 : index
    %c0_2 = arith.constant 0 : index
    %2 = vector.load %arg2[%c0_1, %c0_2] : memref<88x32xbf16, #tpu.memory_space<vmem>>, vector<32x12xbf16>
    %c32 = arith.constant 32 : index
    %c0_3 = arith.constant 0 : index
    %3 = vector.load %arg2[%c32, %c0_3] : memref<88x32xbf16, #tpu.memory_space<vmem>>, vector<32x32xbf16>
    %c64 = arith.constant 64 : index
    %c0_4 = arith.constant 0 : index
    %4 = vector.load %arg2[%c64, %c0_4] : memref<88x32xbf16, #tpu.memory_space<vmem>>, vector<16x32xbf16>
    %c80 = arith.constant 80 : index
    %c0_5 = arith.constant 0 : index
    %5 = vector.load %arg2[%c80, %c0_5] : memref<88x32xbf16, #tpu.memory_space<vmem>>, vector<2x16xbf16>
    %c0_6 = arith.constant 0 : index
    %c0_7 = arith.constant 0 : index
    %6 = vector.load %arg3[%c0_6, %c0_7] : memref<88x1xf32, #tpu.memory_space<vmem>>, vector<32x1xf32>
    %c32_8 = arith.constant 32 : index
    %c0_9 = arith.constant 0 : index
    %7 = vector.load %arg3[%c32_8, %c0_9] : memref<88x1xf32, #tpu.memory_space<vmem>>, vector<32x1xf32>
    %c64_10 = arith.constant 64 : index
    %c0_11 = arith.constant 0 : index
    %8 = vector.load %arg3[%c64_10, %c0_11] : memref<88x1xf32, #tpu.memory_space<vmem>>, vector<16x1xf32>
    %c80_12 = arith.constant 80 : index
    %c0_13 = arith.constant 0 : index
    %9 = vector.load %arg3[%c80_12, %c0_13] : memref<88x1xf32, #tpu.memory_space<vmem>>, vector<2x1xf32>
    "tpu.trace_start"() <{level = 10 : i32, message = "of,bf->ob"}> : () -> ()
    %cst = arith.constant dense<0.000000e+00> : vector<32x128xf32>
    %10 = tpu.matmul %2, %1, %cst {dimension_numbers = #tpu.dot_dimension_numbers<[1], [1], [0], [0], [0, 0, 1, 0], [], []>} : vector<32x12xbf16>, vector<128x12xbf16>, vector<32x128xf32> -> vector<32x128xf32>
    "tpu.trace_stop"() : () -> ()
    %11 = vector.broadcast %6 : vector<32x1xf32> to vector<32x128xf32>
    %12 = arith.addf %10, %11 : vector<32x128xf32>
    %cst_14 = arith.constant 0.000000e+00 : f32
    %13 = vector.broadcast %cst_14 : f32 to vector<32x128xf32>
    %14 = arith.maximumf %12, %13 : vector<32x128xf32>
    %15 = arith.truncf %14 : vector<32x128xf32> to vector<32x128xbf16>
    %cst_15 = arith.constant dense<0.000000e+00> : vector<32x128xf32>
    %16 = tpu.matmul %3, %15, %cst_15 {dimension_numbers = #tpu.dot_dimension_numbers<[1], [0], [0], [1], [0, 0, 1, 1], [], []>} : vector<32x32xbf16>, vector<32x128xbf16>, vector<32x128xf32> -> vector<32x128xf32>
    %17 = vector.broadcast %7 : vector<32x1xf32> to vector<32x128xf32>
    %18 = arith.addf %16, %17 : vector<32x128xf32>
    %cst_16 = arith.constant 0.000000e+00 : f32
    %19 = vector.broadcast %cst_16 : f32 to vector<32x128xf32>
    %20 = arith.maximumf %18, %19 : vector<32x128xf32>
    %21 = arith.truncf %20 : vector<32x128xf32> to vector<32x128xbf16>
    %cst_17 = arith.constant dense<0.000000e+00> : vector<16x128xf32>
    %22 = tpu.matmul %4, %21, %cst_17 {dimension_numbers = #tpu.dot_dimension_numbers<[1], [0], [0], [1], [0, 0, 1, 1], [], []>} : vector<16x32xbf16>, vector<32x128xbf16>, vector<16x128xf32> -> vector<16x128xf32>
    %23 = vector.broadcast %8 : vector<16x1xf32> to vector<16x128xf32>
    %24 = arith.addf %22, %23 : vector<16x128xf32>
    %cst_18 = arith.constant 0.000000e+00 : f32
    %25 = vector.broadcast %cst_18 : f32 to vector<16x128xf32>
    %26 = arith.maximumf %24, %25 : vector<16x128xf32>
    %27 = arith.truncf %26 : vector<16x128xf32> to vector<16x128xbf16>
    %cst_19 = arith.constant dense<0.000000e+00> : vector<2x128xf32>
    %28 = tpu.matmul %5, %27, %cst_19 {dimension_numbers = #tpu.dot_dimension_numbers<[1], [0], [0], [1], [0, 0, 1, 1], [], []>} : vector<2x16xbf16>, vector<16x128xbf16>, vector<2x128xf32> -> vector<2x128xf32>
    %29 = vector.broadcast %9 : vector<2x1xf32> to vector<2x128xf32>
    %30 = arith.addf %28, %29 : vector<2x128xf32>
    %c0_20 = arith.constant 0 : index
    %c0_21 = arith.constant 0 : index
    %31 = vector.load %arg4[%c0_20, %c0_21] : memref<2x128xf32, #tpu.memory_space<vmem>>, vector<2x128xf32>
    tpu.vector_store %arg4[%c0_20, %c0_21], %30 {strides = array<i32>} : memref<2x128xf32, #tpu.memory_space<vmem>>, vector<2x128xf32>,
    return
  }
  func.func @transform_0(%arg0: i32) -> (i32, i32) {
    %c0_i32 = arith.constant 0 : i32
    %c0_i32_0 = arith.constant 0 : i32
    return %arg0, %c0_i32 : i32, i32
  }
  func.func @transform_1(%arg0: i32) -> (i32, i32) {
    %c0_i32 = arith.constant 0 : i32
    %c0_i32_0 = arith.constant 0 : i32
    %c0_i32_1 = arith.constant 0 : i32
    return %c0_i32, %c0_i32_0 : i32, i32
  }
  func.func @transform_2(%arg0: i32) -> (i32, i32) {
    %c0_i32 = arith.constant 0 : i32
    %c0_i32_0 = arith.constant 0 : i32
    %c0_i32_1 = arith.constant 0 : i32
    return %c0_i32, %c0_i32_0 : i32, i32
  }
  func.func @transform_3(%arg0: i32) -> (i32, i32) {
    %c0_i32 = arith.constant 0 : i32
    %c0_i32_0 = arith.constant 0 : i32
    return %c0_i32, %arg0 : i32, i32
  }
}

</mosaic_0001>

<bundles_post_ra>
// kernel: neuro_fuzzy_forward.1
= control target key start
LH: loop header
LB: loop body
LE: loop exit
PB: predicated region body
PF: predicated region fallthrough
CT: control target
= control target key end

     0   :  { %vm92_vm0 = vcmask 97280   ;;  %s483_s0 = inlined_call_operand.vmem [shape: f32[128,12], index: 0, kind: input, shape index: {}]   ;;  %s484_s1 = inlined_call_operand.vmem [shape: bf16[88,32], index: 1, kind: input, shape index: {}]   ;;  %s485_s2 = inlined_call_operand.vmem [shape: f32[88,1], index: 2, kind: input, shape index: {}]   ;;  %s486_s3 = inlined_call_operand.hbm [shape: f32[2,128], index: 3, kind: output, shape index: {}]  }
   0x1   :  { %v30_v0 = vld [vmem:[%s483_s0 + $0x70] sm:$0xff]  ;;  %v31_v1 = vld [vmem:[%s483_s0 + $0x78] sm:$0xff]  ;;  %v28_v3 = vld [vmem:[%s483_s0 + $0x60] sm:$0xff] }
   0x2   :  { %v39_v2 = vpack.c.bf16 %v31_v1, %v30_v0  ;;  %v29_v4 = vld [vmem:[%s483_s0 + $0x68] sm:$0xff] }
   0x4   :  { %v121_v5 = vsel %vm92_vm0, %v39_v2, 0 }
   0x5   :  { %8 = vsyncpa [#allocation3], 0  ;;  %123 = vmatpush.bf16.xpose.msra.mxu0 %v121_v5  ;;  %v38_v6 = vpack.c.bf16 %v29_v4, %v28_v3  ;;  %v26_v8 = vld [vmem:[%s483_s0 + $0x50] sm:$0xff]  ;;  %v27_v9 = vld [vmem:[%s483_s0 + $0x58] sm:$0xff]  ;;  %v346_v24 = vmov 0   ;;  %vm178_vm1 = vcmask 261120  }
   0x6   :  { %v37_v10 = vpack.c.bf16 %v27_v9, %v26_v8  ;;  %v24_v12 = vld [vmem:[%s483_s0 + $0x40] sm:$0xff]  ;;  %v25_v13 = vld [vmem:[%s483_s0 + $0x48] sm:$0xff]  ;;  %v22_v16 = vld [vmem:[%s483_s0 + $0x30] sm:$0xff]  ;;  %317 = vset.pattern.permute.xlu0 %v346_v24  ;;  %318 = vset.pattern.permute.xlu1 %v346_v24  ;;  %vm250_vm2 = vcmask 130048   ;;  %s347_s22 = smov [#allocation2]   ;;  %s275_s26 = sshll.u32 %s486_s3, 4  ;;  %s276_s26 = int_to_ptr.hbm [resolvable:$true] %s275_s26 }
   0x7   :  { %v118_v7 = vsel %vm92_vm0, %v38_v6, 0  ;;  %v36_v14 = vpack.c.bf16 %v25_v13, %v24_v12  ;;  %v23_v17 = vld [vmem:[%s483_s0 + $0x38] sm:$0xff]  ;;  %v20_v20 = vld [vmem:[%s483_s0 + $0x20] sm:$0xff]  ;;  %v21_v21 = vld [vmem:[%s483_s0 + $0x28] sm:$0xff]  ;;  %319 = vset.pattern.permute.xlu2 %v346_v24  ;;  %s273_s23 = sshll.u32 %s347_s22, 4  ;;  %s274_s23 = int_to_ptr.vmem [resolvable:$true] %s273_s23 }
   0x8   :  { %v115_v11 = vsel %vm92_vm0, %v37_v10, 0  ;;  %v35_v18 = vpack.c.bf16 %v23_v17, %v22_v16  ;;  %v53_v22 = vld [vmem:[%s485_s2 + $0x10] sm:$0xff]  ;;  %v51_v23 = vld [vmem:[%s485_s2] sm:$0xff]  ;;  %v34_v25 = vpack.c.bf16 %v21_v21, %v20_v20  ;;  %v19_v28 = vld [vmem:[%s483_s0 + $0x18] sm:$0xff] }
   0x9   :  { %v112_v15 = vsel %vm92_vm0, %v36_v14, 0  ;;  %74 = vperm.xlu0 %317, %v53_v22   ;;  %64 = vperm.xlu1 %318, %v51_v23   ;;  %v18_v27 = vld [vmem:[%s483_s0 + $0x10] sm:$0xff]  ;;  %v54_v29 = vld [vmem:[%s485_s2 + $0x18] sm:$0xff]  ;;  %v52_v30 = vld [vmem:[%s485_s2 + $0x8] sm:$0xff] }
   0xa   :  { %v109_v19 = vsel %vm92_vm0, %v35_v18, 0  ;;  %v106_v26 = vsel %vm92_vm0, %v34_v25, 0  ;;  %v33_v31 = vpack.c.bf16 %v19_v28, %v18_v27  ;;  %v16_v33 = vld [vmem:[%s483_s0] sm:$0xff]  ;;  %v17_v34 = vld [vmem:[%s483_s0 + $0x8] sm:$0xff]  ;;  %v61_v40 = vld [vmem:[%s485_s2 + $0x50] sm:$0x3] }
   0xb   :  { %v55_v35 = vld [vmem:[%s485_s2 + $0x20] sm:$0xff]  ;;  %v56_v36 = vld [vmem:[%s485_s2 + $0x28] sm:$0xff]  ;;  %v32_v37 = vpack.c.bf16 %v17_v34, %v16_v33  ;;  %v57_v48 = vld [vmem:[%s485_s2 + $0x30] sm:$0xff] }
   0xc   :  { %v103_v32 = vsel %vm92_vm0, %v33_v31, 0  ;;  %v60_v39 = vld [vmem:[%s485_s2 + $0x48] sm:$0xff]  ;;  %v310_v41 = vld [vmem:[%s484_s1] sm:$0xff]  ;;  %160 = vperm.xlu2 %319, %v57_v48   ;;  %v58_v58 = vld [vmem:[%s485_s2 + $0x38] sm:$0xff] }
   0xd   :  { %124 = vmatpush.bf16.xpose.msra.mxu0 %v118_v7  ;;  %v100_v38 = vsel %vm92_vm0, %v32_v37, 0  ;;  %v311_v42 = vld [vmem:[%s484_s1 + $0x8] sm:$0xff]  ;;  %v312_v63 = vld [vmem:[%s484_s1 + $0x10] sm:$0xff]  ;;  %v59_v0 = vld [vmem:[%s485_s2 + $0x40] sm:$0xff] }
   0xe   :  { %v313_v1 = vld [vmem:[%s484_s1 + $0x18] sm:$0xff]  ;;  %v314_v20 = vld [vmem:[%s484_s1 + $0x20] sm:$0xff] }
  0x11   :  { %79 = vperm.xlu0 %317, %v54_v29   ;;  %69 = vperm.xlu1 %318, %v52_v30   ;;  %v50_v30 = vld [vmem:[%s484_s1 + $0x28] sm:$0x1] }
  0x14   :  { %165 = vperm.xlu2 %319, %v58_v58  }
  0x15   :  { %125 = vmatpush.bf16.xpose.msra.mxu0 %v115_v11 }
  0x19   :  { %150 = vperm.xlu0 %317, %v55_v35   ;;  %155 = vperm.xlu1 %318, %v56_v36  }
  0x1c   :  { %212 = vperm.xlu2 %319, %v59_v0  }
  0x1d   :  { %126 = vmatpush.bf16.xpose.msra.mxu0 %v112_v15 }
  0x21   :  { %217 = vperm.xlu0 %317, %v60_v39   ;;  %247 = vperm.xlu1 %318, %v61_v40  }
  0x25   :  { %127 = vmatpush.bf16.xpose.msra.mxu0 %v109_v19 }
  0x2d   :  { %128 = vmatpush.bf16.xpose.msra.mxu0 %v106_v26 }
  0x35   :  { %129 = vmatpush.bf16.xpose.msra.mxu0 %v103_v32 }
  0x3d   :  { %130 = vmatpush.bf16.xpose.msra.mxu0 %v100_v38 }
  0x44   :  { %292 = vmatmul.msk.bf16.vlgmr.msra.gmra.mxu0 %vm92_vm0, %v310_v41 }
  0x54   :  { %293 = vmatmul.msk.bf16.gmra.mxu0 %vm92_vm0, %v311_v42 }
  0x66   :  { %v161_v4 = vpop.permute.xlu2 %160 }
  0x6e   :  { %v166_v8 = vpop.permute.xlu2 %165 }
  0x76   :  { %v213_v22 = vpop.permute.xlu2 %212 }
  0x7b   :  { %v75_v45 = vpop.permute.xlu0 %74  ;;  %v65_v46 = vpop.permute.xlu1 %64 }
  0x83   :  { %v80_v49 = vpop.permute.xlu0 %79  ;;  %v70_v51 = vpop.permute.xlu1 %69 }
  0x8b   :  { %v156_v6 = vpop.permute.xlu1 %155  ;;  %v151_v12 = vpop.permute.xlu0 %150 }
  0x93   :  { %v218_v24 = vpop.permute.xlu0 %217  ;;  %v248_v31 = vpop.permute.xlu1 %247 }
  0xc1   :  { %v132_v43 = vpop.f32.mrf.mxu0 }
  0xc2   :  { %v133_v55 = vadd.f32 %v132_v43, %v65_v46 }
  0xc4   :  { %v142_v61 = vmax.f32 %v133_v55, 0.0 }
  0xc9   :  { %v134_v44 = vpop.f32.mrf.mxu0 }
  0xca   :  { %v135_v53 = vadd.f32 %v134_v44, %v70_v51 }
  0xcc   :  { %v143_v59 = vmax.f32 %v135_v53, 0.0 }
  0xce   :  { %v146_v62 = vpack.c.bf16 %v143_v59, %v142_v61 }
  0xd1   :  { %v137_v47 = vpop.f32.mrf.mxu0 }
  0xd2   :  { %v138_v50 = vadd.f32 %v137_v47, %v75_v45 }
  0xd4   :  { %v144_v56 = vmax.f32 %v138_v50, 0.0 }
  0xd9   :  { %v139_v52 = vpop.f32.mrf.mxu0 }
  0xda   :  { %v140_v54 = vadd.f32 %v139_v52, %v80_v49 }
  0xdc   :  { %v145_v57 = vmax.f32 %v140_v54, 0.0 }
  0xde   :  { %v147_v60 = vpack.c.bf16 %v145_v57, %v144_v56 }
  0xe0   :  { %191 = vmatpush.bf16.msra.mxu1 %v147_v60 }
  0xe4   :  { %192 = vmatpush.bf16.msra.mxu1 %v146_v62 }
  0xe7   :  { %302 = vmatmul.msk.bf16.vlgmr.msra.gmra.mxu1 %vm178_vm1, %v312_v63 }
  0xf7   :  { %303 = vmatmul.msk.bf16.gmra.mxu1 %vm178_vm1, %v313_v1 }
 0x164   :  { %v194_v2 = vpop.f32.mrf.mxu1 }
 0x165   :  { %v195_v13 = vadd.f32 %v194_v2, %v151_v12 }
 0x167   :  { %v204_v18 = vmax.f32 %v195_v13, 0.0 }
 0x16c   :  { %v196_v3 = vpop.f32.mrf.mxu1 }
 0x16d   :  { %v197_v10 = vadd.f32 %v196_v3, %v156_v6 }
 0x16f   :  { %v205_v16 = vmax.f32 %v197_v10, 0.0 }
 0x171   :  { %v208_v19 = vpack.c.bf16 %v205_v16, %v204_v18 }
 0x174   :  { %v199_v5 = vpop.f32.mrf.mxu1 }
 0x175   :  { %v200_v7 = vadd.f32 %v199_v5, %v161_v4 }
 0x177   :  { %v206_v14 = vmax.f32 %v200_v7, 0.0 }
 0x17c   :  { %v201_v9 = vpop.f32.mrf.mxu1 }
 0x17d   :  { %v202_v11 = vadd.f32 %v201_v9, %v166_v8 }
 0x17f   :  { %v207_v15 = vmax.f32 %v202_v11, 0.0 }
 0x181   :  { %v209_v17 = vpack.c.bf16 %v207_v15, %v206_v14 }
 0x183   :  { %234 = vmatpush.bf16.msra.mxu2 %v209_v17 }
 0x187   :  { %235 = vmatpush.bf16.msra.mxu2 %v208_v19 }
 0x18a   :  { %308 = vmatmul.msk.bf16.vlgmr.msra.gmra.mxu2 %vm178_vm1, %v314_v20 }
 0x20d   :  { %v237_v21 = vpop.f32.mrf.mxu2 }
 0x20e   :  { %v238_v23 = vadd.f32 %v237_v21, %v213_v22 }
 0x210   :  { %v242_v27 = vmax.f32 %v238_v23, 0.0 }
 0x215   :  { %v239_v25 = vpop.f32.mrf.mxu2 }
 0x216   :  { %v240_v26 = vadd.f32 %v239_v25, %v218_v24 }
 0x218   :  { %v243_v28 = vmax.f32 %v240_v26, 0.0 }
 0x21a   :  { %v244_v29 = vpack.c.bf16 %v243_v28, %v242_v27 }
 0x21c   :  { %261 = vmatpush.bf16.msra.mxu3 %v244_v29 }
 0x21f   :  { %309 = vmatmul.msk.bf16.vlgmr.msra.gmra.mxu3 %vm250_vm2, %v50_v30 }
 0x2a2   :  { %v263_v32 = vpop.f32.mrf.mxu3 }
 0x2a3   :  { %v264_v33 = vadd.f32 %v263_v32, %v248_v31 }
 0x2a5   :  { %267 = vst [vmem:[#allocation2] sm:$0x3] %v264_v33 }
 0x2a6   :  { %278 = dma.vmem_to_hbm [thread:$0]  %s274_s23, 32, %s276_s26, [#allocation3]  }
 0x2aa   :  { %v265_v34 = vpop.f32.mrf.mxu3 }
 0x2ab   :  { %344 = dma.done.wait [#allocation3], 32  }
 0x2ac   :  { %345 = vsyncadd [#allocation3], 4294967264 }
 0x2ad   :  { %283 = vsyncpa [#allocation3], 1 }

</bundles_post_ra>
